<compile_context>
chip_gen: v5e
topology: v5e:2x2
jax: 0.10.0
libtpu: 0.0.40
codegen_flags: <defaults>
</compile_context>

<pallas_src>
import math
import functools

import jax
import jax.numpy as jnp
from jax.experimental import pallas as pl
from jax.experimental.pallas import tpu as pltpu

_MIB = 1024 * 1024


# --------------------------------------------------------------------------- kernels
def _ffn_kernel_resident(x_ref, w1_ref, b1_ref, w2_ref, b2_ref, g_ref, beta_ref,
                         o_ref, *, eps):
    """Whole-inner-dim kernel: weights resident in VMEM, 1-D row-tile grid."""
    x = x_ref[...]
    x_mxu = x if x.dtype == w1_ref.dtype else x.astype(w1_ref.dtype)

    # dense_1: (tm, H) @ (H, 4H) -> fp32, + bias
    h = jnp.dot(x_mxu, w1_ref[...], preferred_element_type=jnp.float32)
    h = h + b1_ref[...].astype(jnp.float32)
    # exact erf-based GELU (matches the torch.erf formulation), fp32
    h = h * 0.5 * (1.0 + jax.lax.erf(h * (1.0 / math.sqrt(2.0))))

    # dense_2: (tm, 4H) @ (4H, H) -> fp32
    if h.dtype != w2_ref.dtype:
        h = h.astype(w2_ref.dtype)
    y = jnp.dot(h, w2_ref[...], preferred_element_type=jnp.float32)

    # dropout is identity in eval mode
    # TODO(synk): training-mode dropout (hidden_dropout_prob) not implemented.
    y = y + b2_ref[...].astype(jnp.float32) + x.astype(jnp.float32)

    # residual + TF-style LayerNorm (biased variance, eps inside sqrt), fp32
    u = jnp.mean(y, axis=-1, keepdims=True)
    d = y - u
    s = jnp.mean(d * d, axis=-1, keepdims=True)
    y = d * jax.lax.rsqrt(s + eps)
    y = g_ref[...].astype(jnp.float32) * y + beta_ref[...].astype(jnp.float32)
    o_ref[...] = y.astype(o_ref.dtype)


def _ffn_kernel_split(x_ref, w1_ref, b1_ref, w2_ref, b2_ref, g_ref, beta_ref,
                      o_ref, acc_ref, *scratch, eps):
    """k-axis over the inner (4H) dim with an fp32 VMEM accumulator.

    Optional trailing scratch ref holds x cast once to the weight dtype
    (hoists the per-k recast of the resident x tile).
    """
    k = pl.program_id(1)
    xw_ref = scratch[0] if scratch else None

    @pl.when(k == 0)
    def _():
        acc_ref[...] = jnp.zeros_like(acc_ref)
        if xw_ref is not None:
            xw_ref[...] = x_ref[...].astype(xw_ref.dtype)

    x_mxu = xw_ref[...] if xw_ref is not None else x_ref[...]

    # dense_1 chunk: (tm, H) @ (H, tk) -> fp32, + bias chunk, GELU in fp32
    h = jnp.dot(x_mxu, w1_ref[...], preferred_element_type=jnp.float32)
    h = h + b1_ref[...].astype(jnp.float32)
    h = h * 0.5 * (1.0 + jax.lax.erf(h * (1.0 / math.sqrt(2.0))))

    # dense_2 partial product: (tm, tk) @ (tk, H), accumulated in fp32 VMEM scratch
    if h.dtype != w2_ref.dtype:
        h = h.astype(w2_ref.dtype)
    acc_ref[...] += jnp.dot(h, w2_ref[...], preferred_element_type=jnp.float32)

    @pl.when(k == pl.num_programs(1) - 1)
    def _():
        # dropout is identity in eval mode
        # TODO(synk): training-mode dropout (hidden_dropout_prob) not implemented.
        y = acc_ref[...] + b2_ref[...].astype(jnp.float32) + x_ref[...].astype(jnp.float32)
        u = jnp.mean(y, axis=-1, keepdims=True)
        d = y - u
        s = jnp.mean(d * d, axis=-1, keepdims=True)
        y = d * jax.lax.rsqrt(s + eps)
        y = g_ref[...].astype(jnp.float32) * y + beta_ref[...].astype(jnp.float32)
        o_ref[...] = y.astype(o_ref.dtype)


# --------------------------------------------------------------------------- planning
def _vmem_budget_bytes(override=None):
    """Per-chip VMEM budget for tile planning and vmem_limit_bytes."""
    if override is not None:
        return int(override)
    try:
        cap = int(pltpu.get_tpu_info().vmem_capacity_bytes)
        # v5e/v6e (128 MiB) -> 100 MiB; v7x (64 MiB) -> ~51 MiB
        return min(int(cap * 0.8), 100 * _MIB)
    except Exception:
        return 48 * _MIB  # safe on every generation (incl. v7x's 64 MiB)


def _round_tile(v):
    """Prefer 256-aligned tiles (v6e/v7x MXU), then 128, then 8."""
    if v >= 256:
        return (v // 256) * 256
    if v >= 128:
        return (v // 128) * 128
    return max(8, (v // 8) * 8)


def _tk_candidates(inner, cap=2048):
    """Divisors of `inner` that are 128-aligned, descending (largest first)."""
    cands = []
    c = (min(inner, cap) // 128) * 128
    while c >= 128:
        if inner % c == 0:
            cands.append(c)
        c -= 128
    return cands if cands else [inner]


def _plan_tiles(M, H, inner, x_itemsize, w_itemsize, budget, tm_want, tk_want):
    """Pick (tm, tk).  tk == inner means the weight-resident (no k axis) path."""
    if tk_want is not None and tk_want < inner and (inner % tk_want or tk_want % 128):
        tk_want = None  # illegal explicit tk -> auto

    small = 2 * (inner + 3 * H) * 4  # biases / gamma / beta, double-buffered

    def fits_resident(tm):
        w = 4 * H * inner * w_itemsize          # w1 + w2, double-buffered
        io = 4 * tm * H * x_itemsize            # x + out, double-buffered
        tmp = tm * inner * 4 + 2 * tm * H * 4   # fp32 h + epilogue temps
        return w + io + tmp + small <= budget

    def fits_split(tm, tk):
        w = 4 * H * tk * w_itemsize             # w1/w2 chunks, double-buffered
        io = 4 * tm * H * x_itemsize
        extra = tm * H * (4 + w_itemsize)       # fp32 acc + x-cast scratch
        tmp = tm * tk * 4 + 2 * tm * H * 4
        return w + io + extra + tmp + small <= budget

    tm = M if M <= tm_want else _round_tile(tm_want)
    tm = max(8, min(tm, M))
    while True:
        if tk_want is None:
            if fits_resident(tm):
                return tm, inner
            for tk in _tk_candidates(inner):     # shrink tk before tm
                if fits_split(tm, tk):
                    return tm, tk
        elif tk_want >= inner:
            if fits_resident(tm):
                return tm, inner
        elif fits_split(tm, tk_want):
            return tm, tk_want
        if tm <= 8:
            return tm, (tk_want if tk_want is not None else _tk_candidates(inner)[-1])
        tm = _round_tile(max(8, tm // 2))


# --------------------------------------------------------------------------- wrapper
def feed_forward(x, params, *, eps=1e-12, tm=None, tk=None, vmem_limit_bytes=None):
    """x: (B, S, H). params: dict of w1, b1, w2, b2, gamma, beta.

    Pass bf16 w1/w2 for the fast MXU / half-HBM-traffic path on ALL generations
    (v5e/v6e/v7x); matmul accumulation and the epilogue stay fp32.
    tm/tk/vmem_limit_bytes default to per-chip auto-planning.
    """
    B, S, H = x.shape
    M = B * S
    inner = params["w1"].shape[1]
    w_dtype = params["w1"].dtype
    w_itemsize = jnp.dtype(w_dtype).itemsize
    x_itemsize = jnp.dtype(x.dtype).itemsize

    budget = _vmem_budget_bytes(vmem_limit_bytes)
    tm_want = 512 if tm is None else int(tm)
    tm_sel, tk_sel = _plan_tiles(M, H, inner, x_itemsize, w_itemsize,
                                 budget, tm_want, tk)

    xf = x.reshape(M, H)
    b1 = params["b1"].reshape(1, inner)
    b2 = params["b2"].reshape(1, H)
    gamma = params["gamma"].reshape(1, H)
    beta = params["beta"].reshape(1, H)

    num_row_tiles = pl.cdiv(M, tm_sel)
    w_bytes = (params["w1"].size + params["w2"].size) * w_itemsize
    io_bytes = 2 * M * H * x_itemsize
    flops = 4 * M * H * inner            # two matmuls, 2*M*H*inner each
    transc = M * inner                   # erf on the (M, 4H) activation

    if tk_sel >= inner:
        # Weight-resident path: w1/w2 DMA'd once, no k axis, no accumulator scratch.
        cost = pl.CostEstimate(flops=flops, transcendentals=transc,
                               bytes_accessed=io_bytes + w_bytes)
        out = pl.pallas_call(
            functools.partial(_ffn_kernel_resident, eps=eps),
            out_shape=jax.ShapeDtypeStruct((M, H), x.dtype),
            grid_spec=pltpu.PrefetchScalarGridSpec(
                num_scalar_prefetch=0,
                grid=(num_row_tiles,),
                in_specs=[
                    pl.BlockSpec((tm_sel, H), lambda i: (i, 0)),    # x rows
                    pl.BlockSpec((H, inner), lambda i: (0, 0)),     # w1 (resident)
                    pl.BlockSpec((1, inner), lambda i: (0, 0)),     # b1
                    pl.BlockSpec((inner, H), lambda i: (0, 0)),     # w2 (resident)
                    pl.BlockSpec((1, H), lambda i: (0, 0)),         # b2
                    pl.BlockSpec((1, H), lambda i: (0, 0)),         # gamma
                    pl.BlockSpec((1, H), lambda i: (0, 0)),         # beta
                ],
                out_specs=pl.BlockSpec((tm_sel, H), lambda i: (i, 0)),
            ),
            compiler_params=pltpu.CompilerParams(
                dimension_semantics=("parallel",),
                vmem_limit_bytes=budget),
            cost_estimate=cost,
        )(xf, params["w1"], b1, params["w2"], b2, gamma, beta)
    else:
        # Split path: k axis over the 4H inner dim, fp32 accumulator in VMEM.
        cast_x = x.dtype != w_dtype
        scratch_shapes = [pltpu.VMEM((tm_sel, H), jnp.float32)]
        if cast_x:
            scratch_shapes.append(pltpu.VMEM((tm_sel, H), w_dtype))
        cost = pl.CostEstimate(flops=flops, transcendentals=transc,
                               bytes_accessed=io_bytes + w_bytes * num_row_tiles)
        out = pl.pallas_call(
            functools.partial(_ffn_kernel_split, eps=eps),
            out_shape=jax.ShapeDtypeStruct((M, H), x.dtype),
            grid_spec=pltpu.PrefetchScalarGridSpec(
                num_scalar_prefetch=0,
                grid=(num_row_tiles, inner // tk_sel),
                in_specs=[
                    pl.BlockSpec((tm_sel, H), lambda i, k: (i, 0)),   # x rows (resident over k)
                    pl.BlockSpec((H, tk_sel), lambda i, k: (0, k)),   # w1 inner-dim chunk
                    pl.BlockSpec((1, tk_sel), lambda i, k: (0, k)),   # b1 chunk
                    pl.BlockSpec((tk_sel, H), lambda i, k: (k, 0)),   # w2 inner-dim chunk
                    pl.BlockSpec((1, H), lambda i, k: (0, 0)),        # b2
                    pl.BlockSpec((1, H), lambda i, k: (0, 0)),        # gamma
                    pl.BlockSpec((1, H), lambda i, k: (0, 0)),        # beta
                ],
                out_specs=pl.BlockSpec((tm_sel, H), lambda i, k: (i, 0)),
                scratch_shapes=scratch_shapes,
            ),
            compiler_params=pltpu.CompilerParams(
                dimension_semantics=("parallel", "arbitrary"),
                vmem_limit_bytes=budget),
            cost_estimate=cost,
        )(xf, params["w1"], b1, params["w2"], b2, gamma, beta)

    return out.reshape(B, S, H)


# --------------------------------------------------------------------------- params / ref
def init_params(key, hidden_size):
    inner = 4 * hidden_size
    k1, k2, k3, k4 = jax.random.split(key, 4)
    # nn.Linear default init: U(-1/sqrt(fan_in), 1/sqrt(fan_in))
    lim1 = 1.0 / math.sqrt(hidden_size)
    lim2 = 1.0 / math.sqrt(inner)
    return {
        # stored as (in_features, out_features) so the kernel does x @ W
        "w1": jax.random.uniform(k1, (hidden_size, inner), jnp.float32, -lim1, lim1),
        "b1": jax.random.uniform(k2, (inner,), jnp.float32, -lim1, lim1),
        "w2": jax.random.uniform(k3, (inner, hidden_size), jnp.float32, -lim2, lim2),
        "b2": jax.random.uniform(k4, (hidden_size,), jnp.float32, -lim2, lim2),
        "gamma": jnp.ones((hidden_size,), jnp.float32),
        "beta": jnp.zeros((hidden_size,), jnp.float32),
    }


def feed_forward_ref(x, params, eps=1e-12):
    h = x @ params["w1"] + params["b1"]
    h = h * 0.5 * (1.0 + jax.lax.erf(h / math.sqrt(2.0)))
    h = h @ params["w2"] + params["b2"]
    y = h + x
    u = y.mean(-1, keepdims=True)
    s = ((y - u) ** 2).mean(-1, keepdims=True)
    y = (y - u) / jnp.sqrt(s + eps)
    return params["gamma"] * y + params["beta"]


def _run_case(name, B, S, H, *, tm=None, tk=None, weight_dtype=jnp.float32,
              atol=2e-4, rtol=2e-4):
    key = jax.random.PRNGKey(0)
    kx, kp = jax.random.split(key)
    x = jax.random.normal(kx, (B, S, H), jnp.float32)
    params = init_params(kp, H)

    run_params = dict(params)
    if weight_dtype != jnp.float32:
        run_params["w1"] = params["w1"].astype(weight_dtype)
        run_params["w2"] = params["w2"].astype(weight_dtype)

    out = jax.block_until_ready(feed_forward(x, run_params, tm=tm, tk=tk))
    ref = feed_forward_ref(x, params)  # fp32 reference

    assert out.shape == (B, S, H), (name, out.shape)
    assert bool(jnp.all(jnp.isfinite(out))), name
    err = float(jnp.max(jnp.abs(out - ref)))
    assert jnp.allclose(out, ref, atol=atol, rtol=rtol), (name, err)


if __name__ == "__main__":
    # 1) small shapes matching the module defaults; auto plan -> weight-resident path
    _run_case("small_auto_resident", 2, 8, 32)
    # 2) multiple row tiles at tiny tm (exercises the 1-D row grid, weights resident)
    _run_case("multi_row_tiles", 2, 8, 32, tm=8)
    # 3) forced inner-dim split path (k grid = 2) with fp32 accumulator
    _run_case("inner_reduction_split", 2, 64, 64, tm=32, tk=128)
    # 4) M not divisible by tm (padded last row block, OOB writes dropped)
    _run_case("ragged_rows", 2, 9, 32, tm=8)
    # 5) bf16 weights on the split path (exercises the hoisted x-cast scratch)
    _run_case("bf16_weights_split", 2, 64, 64, tm=64, tk=128,
              weight_dtype=jnp.bfloat16, atol=0.25, rtol=0.25)
    # 6) bf16 weights on the auto (weight-resident) path
    _run_case("bf16_weights_resident", 2, 64, 64,
              weight_dtype=jnp.bfloat16, atol=0.25, rtol=0.25)

    print("KERNEL_OK")
</pallas_src>

<mosaic_0001>
module attributes {stable_mosaic.version = 11 : i64} {
  func.func @_ffn_kernel_resident(%arg0: i32, %arg1: memref<16x32xf32, #tpu.memory_space<vmem>>, %arg2: memref<32x128xf32, #tpu.memory_space<vmem>>, %arg3: memref<1x128xf32, #tpu.memory_space<vmem>>, %arg4: memref<128x32xf32, #tpu.memory_space<vmem>>, %arg5: memref<1x32xf32, #tpu.memory_space<vmem>>, %arg6: memref<1x32xf32, #tpu.memory_space<vmem>>, %arg7: memref<1x32xf32, #tpu.memory_space<vmem>>, %arg8: memref<16x32xf32, #tpu.memory_space<vmem>>) attributes {dimension_semantics = [#tpu.dimension_semantics<parallel>], iteration_bounds = array<i64: 1>, scalar_prefetch = 0 : i64, scratch_operands = 0 : i64, tpu.core_type = #tpu.core_type<tc>, window_params = [{transform_indices = @transform_0, window_bounds = array<i64: 16, 32>}, {pipeline_mode = #tpu.pipeline_mode<synchronous>, transform_indices = @transform_1, window_bounds = array<i64: 32, 128>}, {pipeline_mode = #tpu.pipeline_mode<synchronous>, transform_indices = @transform_2, window_bounds = array<i64: 1, 128>}, {pipeline_mode = #tpu.pipeline_mode<synchronous>, transform_indices = @transform_3, window_bounds = array<i64: 128, 32>}, {pipeline_mode = #tpu.pipeline_mode<synchronous>, transform_indices = @transform_4, window_bounds = array<i64: 1, 32>}, {pipeline_mode = #tpu.pipeline_mode<synchronous>, transform_indices = @transform_5, window_bounds = array<i64: 1, 32>}, {pipeline_mode = #tpu.pipeline_mode<synchronous>, transform_indices = @transform_6, window_bounds = array<i64: 1, 32>}, {transform_indices = @transform_7, window_bounds = array<i64: 16, 32>}]} {
    %c0 = arith.constant 0 : index
    %c0_0 = arith.constant 0 : index
    %0 = vector.load %arg1[%c0, %c0_0] : memref<16x32xf32, #tpu.memory_space<vmem>>, vector<16x32xf32>
    %c0_1 = arith.constant 0 : index
    %c0_2 = arith.constant 0 : index
    %1 = vector.load %arg2[%c0_1, %c0_2] : memref<32x128xf32, #tpu.memory_space<vmem>>, vector<32x128xf32>
    %cst = arith.constant dense<0.000000e+00> : vector<16x128xf32>
    %2 = tpu.matmul %0, %1, %cst {dimension_numbers = #tpu.dot_dimension_numbers<[1], [0], [0], [1], [0, 0, 1, 1], [], []>} : vector<16x32xf32>, vector<32x128xf32>, vector<16x128xf32> -> vector<16x128xf32>
    %c0_3 = arith.constant 0 : index
    %c0_4 = arith.constant 0 : index
    %3 = vector.load %arg3[%c0_3, %c0_4] : memref<1x128xf32, #tpu.memory_space<vmem>>, vector<1x128xf32>
    %4 = vector.broadcast %3 : vector<1x128xf32> to vector<16x128xf32>
    %5 = arith.addf %2, %4 : vector<16x128xf32>
    %cst_5 = arith.constant 5.000000e-01 : f32
    %6 = vector.broadcast %cst_5 : f32 to vector<16x128xf32>
    %7 = arith.mulf %5, %6 : vector<16x128xf32>
    %cst_6 = arith.constant 0.707106769 : f32
    %8 = vector.broadcast %cst_6 : f32 to vector<16x128xf32>
    %9 = arith.mulf %5, %8 : vector<16x128xf32>
    %10 = math.erf %9 : vector<16x128xf32>
    %cst_7 = arith.constant 1.000000e+00 : f32
    %11 = vector.broadcast %cst_7 : f32 to vector<16x128xf32>
    %12 = arith.addf %11, %10 : vector<16x128xf32>
    %13 = arith.mulf %7, %12 : vector<16x128xf32>
    %c0_8 = arith.constant 0 : index
    %c0_9 = arith.constant 0 : index
    %14 = vector.load %arg4[%c0_8, %c0_9] : memref<128x32xf32, #tpu.memory_space<vmem>>, vector<128x32xf32>
    %cst_10 = arith.constant dense<0.000000e+00> : vector<16x32xf32>
    %15 = tpu.matmul %13, %14, %cst_10 {dimension_numbers = #tpu.dot_dimension_numbers<[1], [0], [0], [1], [0, 0, 1, 1], [], []>} : vector<16x128xf32>, vector<128x32xf32>, vector<16x32xf32> -> vector<16x32xf32>
    %c0_11 = arith.constant 0 : index
    %c0_12 = arith.constant 0 : index
    %16 = vector.load %arg5[%c0_11, %c0_12] : memref<1x32xf32, #tpu.memory_space<vmem>>, vector<1x32xf32>
    %17 = vector.broadcast %16 : vector<1x32xf32> to vector<16x32xf32>
    %18 = arith.addf %15, %17 : vector<16x32xf32>
    %19 = arith.addf %18, %0 : vector<16x32xf32>
    %cst_13 = arith.constant dense<0.000000e+00> : vector<16xf32>
    %20 = vector.multi_reduction <add>, %19, %cst_13 [1] : vector<16x32xf32> to vector<16xf32>
    %21 = vector.shape_cast %20 : vector<16xf32> to vector<16x1xf32>
    %cst_14 = arith.constant 3.200000e+01 : f32
    %22 = vector.broadcast %cst_14 : f32 to vector<16x1xf32>
    %23 = arith.divf %21, %22 : vector<16x1xf32>
    %24 = vector.broadcast %23 : vector<16x1xf32> to vector<16x32xf32>
    %25 = arith.subf %19, %24 : vector<16x32xf32>
    %26 = arith.mulf %25, %25 : vector<16x32xf32>
    %cst_15 = arith.constant dense<0.000000e+00> : vector<16xf32>
    %27 = vector.multi_reduction <add>, %26, %cst_15 [1] : vector<16x32xf32> to vector<16xf32>
    %28 = vector.shape_cast %27 : vector<16xf32> to vector<16x1xf32>
    %cst_16 = arith.constant 3.200000e+01 : f32
    %29 = vector.broadcast %cst_16 : f32 to vector<16x1xf32>
    %30 = arith.divf %28, %29 : vector<16x1xf32>
    %cst_17 = arith.constant 9.99999996E-13 : f32
    %31 = vector.broadcast %cst_17 : f32 to vector<16x1xf32>
    %32 = arith.addf %30, %31 : vector<16x1xf32>
    %33 = math.rsqrt %32 : vector<16x1xf32>
    %34 = vector.broadcast %33 : vector<16x1xf32> to vector<16x32xf32>
    %35 = arith.mulf %25, %34 : vector<16x32xf32>
    %c0_18 = arith.constant 0 : index
    %c0_19 = arith.constant 0 : index
    %36 = vector.load %arg6[%c0_18, %c0_19] : memref<1x32xf32, #tpu.memory_space<vmem>>, vector<1x32xf32>
    %37 = vector.broadcast %36 : vector<1x32xf32> to vector<16x32xf32>
    %38 = arith.mulf %37, %35 : vector<16x32xf32>
    %c0_20 = arith.constant 0 : index
    %c0_21 = arith.constant 0 : index
    %39 = vector.load %arg7[%c0_20, %c0_21] : memref<1x32xf32, #tpu.memory_space<vmem>>, vector<1x32xf32>
    %40 = vector.broadcast %39 : vector<1x32xf32> to vector<16x32xf32>
    %41 = arith.addf %38, %40 : vector<16x32xf32>
    %c0_22 = arith.constant 0 : index
    %c0_23 = arith.constant 0 : index
    %42 = vector.load %arg8[%c0_22, %c0_23] : memref<16x32xf32, #tpu.memory_space<vmem>>, vector<16x32xf32>
    tpu.vector_store %arg8[%c0_22, %c0_23], %41 {strides = array<i32>} : memref<16x32xf32, #tpu.memory_space<vmem>>, vector<16x32xf32>,
    return
  }
  func.func @transform_0(%arg0: i32) -> (i32, i32) {
    %c0_i32 = arith.constant 0 : i32
    %c0_i32_0 = arith.constant 0 : i32
    return %arg0, %c0_i32 : i32, i32
  }
  func.func @transform_1(%arg0: i32) -> (i32, i32) {
    %c0_i32 = arith.constant 0 : i32
    %c0_i32_0 = arith.constant 0 : i32
    %c0_i32_1 = arith.constant 0 : i32
    return %c0_i32, %c0_i32_0 : i32, i32
  }
  func.func @transform_2(%arg0: i32) -> (i32, i32) {
    %c0_i32 = arith.constant 0 : i32
    %c0_i32_0 = arith.constant 0 : i32
    %c0_i32_1 = arith.constant 0 : i32
    return %c0_i32, %c0_i32_0 : i32, i32
  }
  func.func @transform_3(%arg0: i32) -> (i32, i32) {
    %c0_i32 = arith.constant 0 : i32
    %c0_i32_0 = arith.constant 0 : i32
    %c0_i32_1 = arith.constant 0 : i32
    return %c0_i32, %c0_i32_0 : i32, i32
  }
  func.func @transform_4(%arg0: i32) -> (i32, i32) {
    %c0_i32 = arith.constant 0 : i32
    %c0_i32_0 = arith.constant 0 : i32
    %c0_i32_1 = arith.constant 0 : i32
    return %c0_i32, %c0_i32_0 : i32, i32
  }
  func.func @transform_5(%arg0: i32) -> (i32, i32) {
    %c0_i32 = arith.constant 0 : i32
    %c0_i32_0 = arith.constant 0 : i32
    %c0_i32_1 = arith.constant 0 : i32
    return %c0_i32, %c0_i32_0 : i32, i32
  }
  func.func @transform_6(%arg0: i32) -> (i32, i32) {
    %c0_i32 = arith.constant 0 : i32
    %c0_i32_0 = arith.constant 0 : i32
    %c0_i32_1 = arith.constant 0 : i32
    return %c0_i32, %c0_i32_0 : i32, i32
  }
  func.func @transform_7(%arg0: i32) -> (i32, i32) {
    %c0_i32 = arith.constant 0 : i32
    %c0_i32_0 = arith.constant 0 : i32
    return %arg0, %c0_i32 : i32, i32
  }
}

</mosaic_0001>

<bundles_post_ra>
// kernel: tpu_custom_call.1
= control target key start
LH: loop header
LB: loop body
LE: loop exit
PB: predicated region body
PF: predicated region fallthrough
CT: control target
= control target key end

     0   :  { %s518_s0 = inlined_call_operand.vmem [shape: f32[16,32], index: 0, kind: input, shape index: {}]   ;;  %s519_s1 = inlined_call_operand.vmem [shape: f32[32,128], index: 1, kind: input, shape index: {}]   ;;  %s520_s2 = inlined_call_operand.vmem [shape: f32[1,128], index: 2, kind: input, shape index: {}]   ;;  %s521_s3 = inlined_call_operand.vmem [shape: f32[128,32], index: 3, kind: input, shape index: {}]   ;;  %s522_s4 = inlined_call_operand.vmem [shape: f32[1,32], index: 4, kind: input, shape index: {}]   ;;  %s523_s5 = inlined_call_operand.vmem [shape: f32[1,32], index: 5, kind: input, shape index: {}]   ;;  %s524_s6 = inlined_call_operand.vmem [shape: f32[1,32], index: 6, kind: input, shape index: {}]   ;;  %s525_s7 = inlined_call_operand.hbm [shape: f32[16,32], index: 7, kind: output, shape index: {}]  }
   0x1   :  { %v32_v0 = vld [vmem:[%s519_s1 + $0x18] sm:$0xff]  ;;  %v31_v1 = vld [vmem:[%s519_s1 + $0x10] sm:$0xff]  ;;  %v30_v2 = vld [vmem:[%s519_s1 + $0x8] sm:$0xff] }
   0x2   :  { %56 = vmatpush.msra.mxu0 %v32_v0 }
   0x4   :  { %57 = vmatpush.msra.mxu0 %v31_v1 }
   0x5   :  { %12 = vsyncpa [#allocation3], 0  ;;  %v29_v3 = vld [vmem:[%s519_s1] sm:$0xff]  ;;  %vm37_vm0 = vcmask 261120   ;;  %v413_v5 = vld [vmem:[%s518_s0 + $0x8] sm:$0xff]  ;;  %s349_s26 = smov 128  }
   0x6   :  { %58 = vmatpush.msra.mxu0 %v30_v2  ;;  %v406_v4 = vld [vmem:[%s518_s0] sm:$0xff]  ;;  %v170_v6 = vld [vmem:[%s521_s3 + $0x78] sm:$0xff]  ;;  %v169_v7 = vld [vmem:[%s521_s3 + $0x70] sm:$0xff] }
   0x7   :  { %175 = vmatpush.msra.mxu1 %v170_v6  ;;  %287 = vmatpush.msra.mxu2 %v170_v6  ;;  %v168_v8 = vld [vmem:[%s521_s3 + $0x68] sm:$0xff]  ;;  %v167_v9 = vld [vmem:[%s521_s3 + $0x60] sm:$0xff]  ;;  %v166_v11 = vld [vmem:[%s521_s3 + $0x58] sm:$0xff] }
   0x8   :  { %59 = vmatpush.msra.mxu0 %v29_v3  ;;  %v307_v10 = vld [vmem:[%s520_s2] ss:$0 sm:$0xff]  ;;  %v165_v13 = vld [vmem:[%s521_s3 + $0x50] sm:$0xff]  ;;  %v164_v15 = vld [vmem:[%s521_s3 + $0x48] sm:$0xff]  ;;  %s350_s2 = smov 8  }
   0x9   :  { %283 = vmatmul.msk.f32.vlgmr.msra.gmra.mxu0 %vm37_vm0, %v406_v4  ;;  %176 = vmatpush.msra.mxu1 %v169_v7  ;;  %v163_v17 = vld [vmem:[%s521_s3 + $0x40] sm:$0xff]  ;;  %v162_v19 = vld [vmem:[%s521_s3 + $0x38] sm:$0xff]  ;;  %v161_v20 = vld [vmem:[%s521_s3 + $0x30] sm:$0xff] }
   0xa   :  { %288 = vmatpush.msra.mxu2 %v169_v7  ;;  %v160_v23 = vld [vmem:[%s521_s3 + $0x28] sm:$0xff]  ;;  %v159_v27 = vld [vmem:[%s521_s3 + $0x20] sm:$0xff]  ;;  %v158_v30 = vld [vmem:[%s521_s3 + $0x18] sm:$0xff] }
   0xb   :  { %177 = vmatpush.msra.mxu1 %v168_v8  ;;  %v157_v34 = vld [vmem:[%s521_s3 + $0x10] sm:$0xff]  ;;  %v156_v37 = vld [vmem:[%s521_s3 + $0x8] sm:$0xff]  ;;  %v155_v42 = vld [vmem:[%s521_s3] sm:$0xff] }
   0xc   :  { %289 = vmatpush.msra.mxu2 %v168_v8 }
   0xd   :  { %178 = vmatpush.msra.mxu1 %v167_v9 }
   0xe   :  { %290 = vmatpush.msra.mxu2 %v167_v9 }
   0xf   :  { %179 = vmatpush.msra.mxu1 %v166_v11 }
  0x10   :  { %291 = vmatpush.msra.mxu2 %v166_v11 }
  0x11   :  { %284 = vmatmul.msk.f32.gmra.mxu0 %vm37_vm0, %v413_v5  ;;  %180 = vmatpush.msra.mxu1 %v165_v13 }
  0x12   :  { %292 = vmatpush.msra.mxu2 %v165_v13 }
  0x13   :  { %181 = vmatpush.msra.mxu1 %v164_v15 }
  0x14   :  { %293 = vmatpush.msra.mxu2 %v164_v15 }
  0x15   :  { %182 = vmatpush.msra.mxu1 %v163_v17 }
  0x16   :  { %294 = vmatpush.msra.mxu2 %v163_v17 }
  0x17   :  { %183 = vmatpush.msra.mxu1 %v162_v19 }
  0x18   :  { %295 = vmatpush.msra.mxu2 %v162_v19 }
  0x19   :  { %184 = vmatpush.msra.mxu1 %v161_v20 }
  0x1a   :  { %296 = vmatpush.msra.mxu2 %v161_v20 }
  0x1b   :  { %185 = vmatpush.msra.mxu1 %v160_v23 }
  0x1c   :  { %297 = vmatpush.msra.mxu2 %v160_v23 }
  0x1d   :  { %186 = vmatpush.msra.mxu1 %v159_v27 }
  0x1e   :  { %298 = vmatpush.msra.mxu2 %v159_v27 }
  0x1f   :  { %187 = vmatpush.msra.mxu1 %v158_v30 }
  0x20   :  { %299 = vmatpush.msra.mxu2 %v158_v30 }
  0x21   :  { %188 = vmatpush.msra.mxu1 %v157_v34 }
  0x22   :  { %300 = vmatpush.msra.mxu2 %v157_v34 }
  0x23   :  { %189 = vmatpush.msra.mxu1 %v156_v37 }
  0x24   :  { %301 = vmatpush.msra.mxu2 %v156_v37 }
  0x25   :  { %190 = vmatpush.msra.mxu1 %v155_v42 }
  0x26   :  { %302 = vmatpush.msra.mxu2 %v155_v42 }
  0x86   :  { %v61_v12 = vpop.f32.mrf.mxu0 }
  0x87   :  { %v438_v14 = vadd.f32 %v307_v10, %v61_v12 }
  0x89   :  { %v444_v16 = vmul.f32 0.70710677, %v438_v14 }
  0x8b   :  { %v71_v18 = vmul.f32 %v444_v16, %v444_v16 }
  0x8d   :  { %v457_v21 = vmin.f32 %v71_v18, 16.0 }
  0x8e   :  { %v64_v22 = vpop.f32.mrf.mxu0 }
  0x8f   :  { %v73_v24 = vmul.f32 2.1237322e-06, %v457_v21  ;;  %v463_v25 = vadd.f32 %v307_v10, %v64_v22  ;;  %v84_v26 = vmul.f32 3.8918573e-05, %v457_v21 }
  0x91   :  { %v74_v28 = vadd.f32 0.00028619796, %v73_v24  ;;  %v470_v29 = vmul.f32 0.70710677, %v463_v25  ;;  %v85_v31 = vadd.f32 0.001143296, %v84_v26 }
  0x93   :  { %v75_v32 = vmul.f32 %v74_v28, %v457_v21  ;;  %v111_v33 = vmul.f32 %v470_v29, %v470_v29  ;;  %v86_v35 = vmul.f32 %v85_v31, %v457_v21 }
  0x95   :  { %v112_v36 = vmin.f32 %v111_v33, 16.0  ;;  %v87_v38 = vadd.f32 0.014752088, %v86_v35  ;;  %v76_v39 = vadd.f32 0.0036580483, %v75_v32  ;;  %v67_v35 = vmul.f32 0.5, %v438_v14 }
  0x96   :  { %v308_v14 = vld [vmem:[%s522_s4] ss:$0 sm:$0xff] }
  0x97   :  { %v113_v40 = vmul.f32 2.1237322e-06, %v112_v36  ;;  %v124_v41 = vmul.f32 3.8918573e-05, %v112_v36  ;;  %v88_v43 = vmul.f32 %v87_v38, %v457_v21  ;;  %v77_v47 = vmul.f32 %v76_v39, %v457_v21 }
  0x99   :  { %v114_v44 = vadd.f32 0.00028619796, %v113_v40  ;;  %v125_v45 = vadd.f32 0.001143296, %v124_v41  ;;  %v89_v46 = vadd.f32 0.112945676, %v88_v43 }
  0x9a   :  { %v78_v54 = vadd.f32 0.05243302, %v77_v47  ;;  %v68_v43 = vmul.f32 0.5, %v463_v25 }
  0x9b   :  { %v115_v48 = vmul.f32 %v114_v44, %v112_v36  ;;  %v126_v49 = vmul.f32 %v125_v45, %v112_v36  ;;  %v90_v50 = vmul.f32 %v89_v46, %v457_v21 }
  0x9c   :  { %v79_v60 = vmul.f32 %v78_v54, %v457_v21 }
  0x9d   :  { %v127_v51 = vadd.f32 0.014752088, %v126_v49  ;;  %v116_v52 = vadd.f32 0.0036580483, %v115_v48  ;;  %v91_v53 = vadd.f32 0.4994258, %v90_v50 }
  0x9e   :  { %v80_v0 = vadd.f32 0.18741608, %v79_v60 }
  0x9f   :  { %v128_v55 = vmul.f32 %v127_v51, %v112_v36  ;;  %v92_v56 = vmul.f32 %v91_v53, %v457_v21  ;;  %v117_v58 = vmul.f32 %v116_v52, %v112_v36  ;;  %v347_v52 = vmov 32.0  }
  0xa0   :  { %v81_v7 = vmul.f32 %v80_v0, %v457_v21 }
  0xa1   :  { %v129_v57 = vadd.f32 0.112945676, %v128_v55  ;;  %v93_v59 = vadd.f32 1.0, %v92_v56  ;;  %v118_v63 = vadd.f32 0.05243302, %v117_v58 }
  0xa2   :  { %v82_v12 = vadd.f32 1.1283791, %v81_v7 }
  0xa3   :  { %v130_v61 = vmul.f32 %v129_v57, %v112_v36  ;;  %311 = vrcp.f32 %v93_v59  ;;  %v119_v6 = vmul.f32 %v118_v63, %v112_v36  ;;  %v105_v11 = vand.u32 2147483648, %v93_v59 }
  0xa4   :  { %v103_v15 = vand.u32 2147483647, %v93_v59  ;;  %vm99_vm2 = vweird.f32 %v93_v59  ;;  %v83_v23 = vmul.f32 %v82_v12, %v444_v16 }
  0xa5   :  { %v131_v62 = vadd.f32 0.4994258, %v130_v61  ;;  %v120_v10 = vadd.f32 0.18741608, %v119_v6  ;;  %v106_v20 = vor.u32 1.1754944e-38, %v105_v11 }
  0xa6   :  { %vm104_vm4 = vcmp.eq.f32.partialorder %v103_v15, 8.507059e+37 }
  0xa7   :  { %v132_v1 = vmul.f32 %v131_v62, %v112_v36  ;;  %v121_v19 = vmul.f32 %v120_v10, %v112_v36 }
  0xa9   :  { %v133_v2 = vadd.f32 1.0, %v132_v1  ;;  %v312_v3 = vpop.eup %311  ;;  %v122_v30 = vadd.f32 1.1283791, %v121_v19  ;;  %v309_v19 = vld [vmem:[%s523_s5] ss:$0 sm:$0xff]  ;;  %s348_s5 = smov [#allocation2]  }
  0xaa   :  { %v95_v8 = vmul.f32 %v312_v3, %v93_v59  ;;  %vm100_vm1 = vweird.f32 %v312_v3  ;;  %s269_s23 = sshll.u32 %s348_s5, 4  ;;  %s270_s23 = int_to_ptr.vmem [resolvable:$true] %s269_s23 }
  0xab   :  { %313 = vrcp.f32 %v133_v2  ;;  %vm101_vm3 = vmor %vm99_vm2, %vm100_vm1  ;;  %v145_v28 = vand.u32 2147483648, %v133_v2  ;;  %v143_v32 = vand.u32 2147483647, %v133_v2  ;;  %vm139_vm6 = vweird.f32 %v133_v2 }
  0xac   :  { %v96_v9 = vsub.f32 1.0, %v95_v8  ;;  %v123_v16 = vmul.f32 %v122_v30, %v470_v29  ;;  %315 = vrcp.f32 %v347_v52 }
  0xad   :  { %v146_v37 = vor.u32 1.1754944e-38, %v145_v28  ;;  %vm144_vm8 = vcmp.eq.f32.partialorder %v143_v32, 8.507059e+37 }
  0xae   :  { %v97_v13 = vmul.f32 %v312_v3, %v96_v9 }
  0xb0   :  { %v98_v18 = vadd.f32 %v312_v3, %v97_v13 }
  0xb1   :  { %v314_v17 = vpop.eup %313 }
  0xb2   :  { %v135_v22 = vmul.f32 %v314_v17, %v133_v2  ;;  %v102_v24 = vsel %vm101_vm3, %v312_v3, %v98_v18  ;;  %vm140_vm5 = vweird.f32 %v314_v17  ;;  %v316_v53 = vpop.eup %315 }
  0xb3   :  { %v107_v21 = vsel %vm104_vm4, %v106_v20, %v102_v24  ;;  %vm141_vm7 = vmor %vm139_vm6, %vm140_vm5  ;;  %v207_v54 = vmul.f32 32.0, %v316_v53  ;;  %vm211_vm9 = vweird.f32 %v316_v53 }
  0xb4   :  { %v136_v26 = vsub.f32 1.0, %v135_v22  ;;  %v108_v27 = vmul.f32 %v107_v21, %v83_v23  ;;  %v310_v23 = vld [vmem:[%s524_s6] ss:$0 sm:$0xff]  ;;  %s271_s6 = sshll.u32 %s525_s7, 4  ;;  %s272_s6 = int_to_ptr.hbm [resolvable:$true] %s271_s6 }
  0xb5   :  { %v208_v55 = vsub.f32 1.0, %v207_v54 }
  0xb6   :  { %v137_v31 = vmul.f32 %v314_v17, %v136_v26  ;;  %v285_v33 = vclamps-f32 %v108_v27, 1.0 }
  0xb7   :  { %v209_v56 = vmul.f32 %v316_v53, %v208_v55 }
  0xb8   :  { %v138_v34 = vadd.f32 %v314_v17, %v137_v31  ;;  %v151_v36 = vadd.f32 1.0, %v285_v33 }
  0xb9   :  { %v210_v57 = vadd.f32 %v316_v53, %v209_v56 }
  0xba   :  { %v142_v38 = vsel %vm141_vm7, %v314_v17, %v138_v34  ;;  %v153_v39 = vmul.f32 %v151_v36, %v67_v35 }
  0xbb   :  { %v147_v40 = vsel %vm144_vm8, %v146_v37, %v142_v38  ;;  %v212_v58 = vsel %vm211_vm9, %v316_v53, %v210_v57 }
  0xbc   :  { %v148_v41 = vmul.f32 %v147_v40, %v123_v16  ;;  %191 = vmatmul.f32.vlgmr.msra.gmra.mxu1 %v153_v39 }
  0xbe   :  { %v286_v42 = vclamps-f32 %v148_v41, 1.0 }
  0xc0   :  { %v152_v44 = vadd.f32 1.0, %v286_v42 }
  0xc2   :  { %v154_v45 = vmul.f32 %v152_v44, %v68_v43 }
  0xc4   :  { %194 = vmatmul.f32.vlgmr.msra.gmra.mxu2 %v154_v45 }
 0x139   :  { %v192_v46 = vpop.f32.mrf.mxu1 }
 0x13a   :  { %v193_v47 = vadd.f32 %v308_v14, %v192_v46 }
 0x13c   :  { %v198_v29 = vadd.f32 %v193_v47, %v406_v4 }
 0x13e   :  { %v200_v48 = vsel %vm37_vm0, %v198_v29, 0.0 }
 0x13f   :  { %201 = vadd.xlane.f32.xlu0 %v200_v48 }
 0x147   :  { %v195_v49 = vpop.f32.mrf.mxu2 }
 0x148   :  { %v196_v50 = vadd.f32 %v308_v14, %v195_v49 }
 0x14a   :  { %v199_v51 = vadd.f32 %v196_v50, %v413_v5 }
 0x14c   :  { %v203_v25 = vsel %vm37_vm0, %v199_v51, 0.0 }
 0x14d   :  { %204 = vadd.xlane.f32.xlu0 %v203_v25 }
 0x1b2   :  { %v202_v4 = vpop.xlane.xlu0 %201 }
 0x1b3   :  { %v213_v59 = vmul.f32 %v212_v58, %v202_v4 }
 0x1b5   :  { %v215_v60 = vsub.f32 %v198_v29, %v213_v59 }
 0x1b7   :  { %v217_v61 = vmul.f32 %v215_v60, %v215_v60 }
 0x1b9   :  { %v219_v62 = vsel %vm37_vm0, %v217_v61, 0.0 }
 0x1ba   :  { %220 = vadd.xlane.f32.xlu1 %v219_v62 }
 0x1c0   :  { %v205_v5 = vpop.xlane.xlu0 %204 }
 0x1c1   :  { %v214_v63 = vmul.f32 %v212_v58, %v205_v5 }
 0x1c3   :  { %v216_v0 = vsub.f32 %v199_v51, %v214_v63 }
 0x1c5   :  { %v218_v1 = vmul.f32 %v216_v0, %v216_v0 }
 0x1c7   :  { %v222_v2 = vsel %vm37_vm0, %v218_v1, 0.0 }
 0x1c8   :  { %223 = vadd.xlane.f32.xlu1 %v222_v2 }
 0x22d   :  { %v221_v3 = vpop.xlane.xlu1 %220 }
 0x22e   :  { %v225_v6 = vmul.f32 %v221_v3, %v212_v58 }
 0x230   :  { %v227_v7 = vadd.f32 1e-12, %v225_v6 }
 0x232   :  { %317 = vrsqrt.f32 %v227_v7  ;;  %vm235_vm11 = vweird.f32 %v227_v7 }
 0x238   :  { %v318_v8 = vpop.eup %317 }
 0x239   :  { %v230_v9 = vmul.f32 %v318_v8, %v227_v7  ;;  %vm236_vm10 = vweird.f32 %v318_v8 }
 0x23a   :  { %vm237_vm12 = vmor %vm235_vm11, %vm236_vm10 }
 0x23b   :  { %v224_v10 = vpop.xlane.xlu1 %223  ;;  %v231_v11 = vmul.f32 %v318_v8, %v230_v9 }
 0x23c   :  { %v226_v12 = vmul.f32 %v224_v10, %v212_v58 }
 0x23d   :  { %v232_v13 = vmul.f32 0.5, %v231_v11 }
 0x23e   :  { %v228_v15 = vadd.f32 1e-12, %v226_v12 }
 0x23f   :  { %v233_v17 = vsub.f32 1.5, %v232_v13 }
 0x240   :  { %319 = vrsqrt.f32 %v228_v15  ;;  %vm245_vm14 = vweird.f32 %v228_v15 }
 0x241   :  { %v234_v18 = vmul.f32 %v318_v8, %v233_v17 }
 0x243   :  { %v238_v20 = vsel %vm237_vm12, %v318_v8, %v234_v18 }
 0x244   :  { %v249_v22 = vmul.f32 %v238_v20, %v215_v60 }
 0x246   :  { %v320_v24 = vpop.eup %319  ;;  %v255_v21 = vmul.f32 %v309_v19, %v249_v22 }
 0x247   :  { %v240_v26 = vmul.f32 %v320_v24, %v228_v15  ;;  %vm246_vm13 = vweird.f32 %v320_v24 }
 0x248   :  { %v261_v28 = vadd.f32 %v310_v23, %v255_v21  ;;  %vm247_vm15 = vmor %vm245_vm14, %vm246_vm13 }
 0x249   :  { %v241_v27 = vmul.f32 %v320_v24, %v240_v26 }
 0x24a   :  { %263 = vst.msk [vmem:[#allocation2] sm:$0xff] %vm37_vm0, %v261_v28 }
 0x24b   :  { %v242_v30 = vmul.f32 0.5, %v241_v27 }
 0x24d   :  { %v243_v31 = vsub.f32 1.5, %v242_v30 }
 0x24f   :  { %v244_v32 = vmul.f32 %v320_v24, %v243_v31 }
 0x251   :  { %v248_v33 = vsel %vm247_vm15, %v320_v24, %v244_v32 }
 0x252   :  { %v250_v34 = vmul.f32 %v248_v33, %v216_v0 }
 0x254   :  { %v256_v35 = vmul.f32 %v309_v19, %v250_v34 }
 0x256   :  { %v262_v36 = vadd.f32 %v310_v23, %v256_v35 }
 0x258   :  { %264 = vst.msk [vmem:[#allocation2 + $0x8] sm:$0xff] %vm37_vm0, %v262_v36 }
 0x259   :  { %277 = dma.vmem_to_hbm [thread:$0]  %s270_s23, 256, %s272_s6, [#allocation3], %s349_s26, %s349_s26, %s350_s2  }
 0x25a   :  { %345 = dma.done.wait [#allocation3], 256  }
 0x25b   :  { %346 = vsyncadd [#allocation3], 4294967040 }
 0x25c   :  { %282 = vsyncpa [#allocation3], 1 }

</bundles_post_ra>
